<compile_context>
chip_gen: v6e
topology: v6e:2x2x1
jax: 0.10.0
libtpu: 0.0.40
codegen_flags: <defaults>
</compile_context>

<pallas_src>
import functools

import numpy as np
import jax
import jax.numpy as jnp
from jax.experimental import pallas as pl
from jax.experimental.pallas import tpu as pltpu


# ----------------------------------------------------------------------------
# helpers
# ----------------------------------------------------------------------------
def _round_up(x, m):
    return ((x + m - 1) // m) * m


def _pick_tm(m):
    """Row-tile: big tiles for big M, but always >=2 grid steps when possible
    (v7x has 2 TensorCores and the M axis is marked 'parallel')."""
    if m >= 1024:
        return 512
    return max(8, _round_up(-(-m // 2), 8))


def gelu_exact(x):
    # TODO(synk): exact erf GELU kept in plain JAX (outside the kernels).
    return jax.nn.gelu(x, approximate=False)


def _interp_matrix_np(out_size, in_size):
    """1-D bilinear (align_corners=True) interpolation matrix (out, in)."""
    A = np.zeros((out_size, in_size), np.float32)
    if in_size == 1:
        A[:, 0] = 1.0
        return A
    for i in range(out_size):
        src = i * (in_size - 1) / (out_size - 1) if out_size > 1 else 0.0
        i0 = min(int(np.floor(src)), in_size - 1)
        i1 = min(i0 + 1, in_size - 1)
        f = src - i0
        A[i, i0] += 1.0 - f
        A[i, i1] += f
    return A


def _adaptive_pool_matrix_np(out_size, in_size):
    """1-D AdaptiveAvgPool matrix (PyTorch floor/ceil bin rule)."""
    P = np.zeros((out_size, in_size), np.float32)
    for i in range(out_size):
        start = (i * in_size) // out_size
        end = -((-(i + 1) * in_size) // out_size)
        P[i, start:end] = 1.0 / (end - start)
    return P


# ----------------------------------------------------------------------------
# Pallas kernels
# ----------------------------------------------------------------------------
def _mm_kernel(want_stats, x_ref, w_ref, b_ref, o_ref, *stat_refs):
    # bf16 MXU matmul, f32 accumulation, f32 bias add.
    y = jnp.dot(x_ref[...].astype(jnp.bfloat16), w_ref[...],
                preferred_element_type=jnp.float32) + b_ref[...]
    o_ref[...] = y
    if want_stats:
        s_ref, q_ref = stat_refs
        s_ref[...] = jnp.sum(y, axis=0, keepdims=True)[None]
        q_ref[...] = jnp.sum(y * y, axis=0, keepdims=True)[None]


def pallas_matmul(x, w, b=None, want_stats=False):
    """(M, K) @ (K, N) + b on the MXU; optional per-channel sum / sum-of-squares
    epilogue (for fused BatchNorm statistics)."""
    M, K = x.shape
    N = w.shape[1]
    w16 = w.astype(jnp.bfloat16)
    b_arr = jnp.zeros((N,), jnp.float32) if b is None else b.astype(jnp.float32)
    b2 = b_arr.reshape(1, N)

    tm = _pick_tm(M)
    mp = _round_up(M, tm)
    xp = x if mp == M else jnp.pad(x, ((0, mp - M), (0, 0)))
    g = mp // tm

    out_shape = [jax.ShapeDtypeStruct((mp, N), jnp.float32)]
    out_specs = [pl.BlockSpec((tm, N), lambda i: (i, 0))]
    if want_stats:
        out_shape += [jax.ShapeDtypeStruct((g, 1, N), jnp.float32)] * 2
        out_specs += [pl.BlockSpec((1, 1, N), lambda i: (i, 0, 0))] * 2

    res = pl.pallas_call(
        functools.partial(_mm_kernel, want_stats),
        out_shape=tuple(out_shape),
        grid=(g,),
        in_specs=[
            pl.BlockSpec((tm, K), lambda i: (i, 0)),
            pl.BlockSpec((K, N), lambda i: (0, 0)),
            pl.BlockSpec((1, N), lambda i: (0, 0)),
        ],
        out_specs=tuple(out_specs),
        compiler_params=pltpu.CompilerParams(dimension_semantics=("parallel",)),
    )(xp, w16, b2)

    y = res[0] if mp == M else res[0][:M]
    if not want_stats:
        return y
    n_pad = mp - M
    # padded rows contribute exactly `bias` to the matmul output; remove them.
    col_sum = jnp.sum(res[1], axis=(0, 1)) - n_pad * b_arr
    col_sq = jnp.sum(res[2], axis=(0, 1)) - n_pad * b_arr * b_arr
    return y, col_sum, col_sq


def _affine_kernel(act, x_ref, s_ref, b_ref, o_ref):
    y = x_ref[...] * s_ref[...] + b_ref[...]
    if act == "relu":
        y = jnp.maximum(y, 0.0)
    o_ref[...] = y


def pallas_affine_act(x, scale, shift, act="none"):
    """y = act(x * scale + shift) on an (M, C) slab.  scale/shift may be
    per-channel (C,) / (1, C) or per-element (M, C)."""
    M, C = x.shape
    per_row = (scale.ndim == 2 and scale.shape[0] == M)
    tm = _pick_tm(M)
    mp = _round_up(M, tm)
    pad = mp - M
    xp = x.astype(jnp.float32)
    if pad:
        xp = jnp.pad(xp, ((0, pad), (0, 0)))
    if per_row:
        s = scale.astype(jnp.float32)
        t = shift.astype(jnp.float32)
        if pad:
            s = jnp.pad(s, ((0, pad), (0, 0)))
            t = jnp.pad(t, ((0, pad), (0, 0)))
        s_spec = pl.BlockSpec((tm, C), lambda i: (i, 0))
    else:
        s = scale.reshape(1, C).astype(jnp.float32)
        t = shift.reshape(1, C).astype(jnp.float32)
        s_spec = pl.BlockSpec((1, C), lambda i: (0, 0))

    out = pl.pallas_call(
        functools.partial(_affine_kernel, act),
        out_shape=jax.ShapeDtypeStruct((mp, C), jnp.float32),
        grid=(mp // tm,),
        in_specs=[pl.BlockSpec((tm, C), lambda i: (i, 0)), s_spec, s_spec],
        out_specs=pl.BlockSpec((tm, C), lambda i: (i, 0)),
        compiler_params=pltpu.CompilerParams(dimension_semantics=("parallel",)),
    )(xp, s, t)
    return out if pad == 0 else out[:M]


def _resample_kernel(has_res, r_ref, x_ref, *rest):
    out = jnp.dot(r_ref[...], x_ref[0], preferred_element_type=jnp.float32)
    if has_res:
        y_ref, o_ref = rest
        out = out + y_ref[0]
    else:
        (o_ref,) = rest
    o_ref[0] = out


def pallas_resample(x_flat, R, residual=None):
    """out[b] = R @ x[b] (+ residual[b]).  x_flat: (B, HiWi, C), R: (HoWo, HiWi).
    One Kronecker-form spatial resample per batch element (grid over B)."""
    B, K, C = x_flat.shape
    Ho = R.shape[0]
    args = [R.astype(jnp.float32), x_flat.astype(jnp.float32)]
    in_specs = [pl.BlockSpec((Ho, K), lambda b: (0, 0)),
                pl.BlockSpec((1, K, C), lambda b: (b, 0, 0))]
    if residual is not None:
        args.append(residual.astype(jnp.float32))
        in_specs.append(pl.BlockSpec((1, Ho, C), lambda b: (b, 0, 0)))
    return pl.pallas_call(
        functools.partial(_resample_kernel, residual is not None),
        out_shape=jax.ShapeDtypeStruct((B, Ho, C), jnp.float32),
        grid=(B,),
        in_specs=in_specs,
        out_specs=pl.BlockSpec((1, Ho, C), lambda b: (b, 0, 0)),
        compiler_params=pltpu.CompilerParams(dimension_semantics=("parallel",)),
    )(*args)


# ----------------------------------------------------------------------------
# ops built on the kernels
# ----------------------------------------------------------------------------
def conv2d(x, w, b=None, stride=1, padding=0, want_stats=False):
    """NHWC conv, PyTorch OIHW weights (Cout, Cin, kh, kw). im2col (bf16) + matmul."""
    B, H, W, C = x.shape
    Cout, Cin, kh, kw = w.shape
    Ho = (H + 2 * padding - kh) // stride + 1
    Wo = (W + 2 * padding - kw) // stride + 1
    w_mat = jnp.transpose(w, (2, 3, 1, 0)).reshape(kh * kw * Cin, Cout)
    if kh == 1 and kw == 1 and stride == 1 and padding == 0:
        cols = x.reshape(B * H * W, C)
    else:
        xp = jnp.pad(x.astype(jnp.bfloat16),
                     ((0, 0), (padding, padding), (padding, padding), (0, 0)))
        taps = []
        for dh in range(kh):
            for dw in range(kw):
                taps.append(xp[:, dh:dh + (Ho - 1) * stride + 1:stride,
                                  dw:dw + (Wo - 1) * stride + 1:stride, :])
        cols = jnp.concatenate(taps, axis=-1).reshape(B * Ho * Wo, kh * kw * Cin)
    res = pallas_matmul(cols, w_mat, b, want_stats=want_stats)
    if want_stats:
        y, s, q = res
        return y.reshape(B, Ho, Wo, Cout), s, q
    return res.reshape(B, Ho, Wo, Cout)


def _bn_scale_shift(col_sum, col_sq, count, gamma, beta, eps=1e-5):
    mean = col_sum / count
    var = jnp.maximum(col_sq / count - mean * mean, 0.0)   # biased (training-mode)
    scale = gamma / jnp.sqrt(var + eps)
    shift = beta - mean * scale
    return scale, shift


def conv_bn_act(x, w, b, gamma, beta, act, stride=1, padding=0):
    """conv -> BatchNorm (batch stats from the matmul epilogue) -> act."""
    y, s, q = conv2d(x, w, b, stride=stride, padding=padding, want_stats=True)
    B, Ho, Wo, Cout = y.shape
    scale, shift = _bn_scale_shift(s, q, float(B * Ho * Wo), gamma, beta)
    flat = pallas_affine_act(y.reshape(B * Ho * Wo, Cout), scale, shift,
                             act="relu" if act == "relu" else "none")
    if act == "gelu":
        flat = gelu_exact(flat)
    return flat.reshape(B, Ho, Wo, Cout)


def _ct_interleave(y_flat, B, H, W, Cout):
    y = y_flat.reshape(B, H, W, 2, 2, Cout).transpose(0, 1, 3, 2, 4, 5)
    return y.reshape(B, 2 * H, 2 * W, Cout)


def convT2x2(x, w, b):
    """ConvTranspose2d kernel=2 stride=2; PyTorch weight (Cin, Cout, 2, 2)."""
    B, H, W, C = x.shape
    Cout = w.shape[1]
    w_mat = jnp.transpose(w, (0, 2, 3, 1)).reshape(C, 4 * Cout)
    y = pallas_matmul(x.reshape(B * H * W, C), w_mat, jnp.tile(b, 4))
    return _ct_interleave(y, B, H, W, Cout)


def convT2x2_bn_gelu(x, w, b, gamma, beta):
    """ConvTranspose2x2 -> BN -> GELU, BN stats fused into the matmul epilogue
    and the affine applied on the pre-interleave slab."""
    B, H, W, C = x.shape
    Cout = w.shape[1]
    w_mat = jnp.transpose(w, (0, 2, 3, 1)).reshape(C, 4 * Cout)
    y, s, q = pallas_matmul(x.reshape(B * H * W, C), w_mat, jnp.tile(b, 4),
                            want_stats=True)
    s_c = s.reshape(4, Cout).sum(axis=0)
    q_c = q.reshape(4, Cout).sum(axis=0)
    scale, shift = _bn_scale_shift(s_c, q_c, float(4 * B * H * W), gamma, beta)
    y = pallas_affine_act(y, jnp.tile(scale, 4), jnp.tile(shift, 4), act="none")
    y = gelu_exact(y)
    return _ct_interleave(y, B, H, W, Cout)


def bilinear_resize_add(x, out_h, out_w, residual=None):
    """Bilinear (align_corners=True) NHWC resize, optional fused residual add."""
    B, H, W, C = x.shape
    if H == out_h and W == out_w:
        return x if residual is None else x + residual
    R = jnp.asarray(np.kron(_interp_matrix_np(out_h, H), _interp_matrix_np(out_w, W)))
    res_flat = None if residual is None else residual.reshape(B, out_h * out_w, C)
    y = pallas_resample(x.reshape(B, H * W, C), R, residual=res_flat)
    return y.reshape(B, out_h, out_w, C)


# ----------------------------------------------------------------------------
# UperNetHead forward
# ----------------------------------------------------------------------------
def feature2pyramid(inputs, p):
    x0, x1, x2, x3 = inputs
    y = convT2x2_bn_gelu(x0, p["up4_ct1_w"], p["up4_ct1_b"],
                         p["up4_bn_g"], p["up4_bn_b"])
    f0 = convT2x2(y, p["up4_ct2_w"], p["up4_ct2_b"])
    f1 = convT2x2_bn_gelu(x1, p["up2_ct_w"], p["up2_ct_b"],
                          p["up2_bn_g"], p["up2_bn_b"])
    f2 = conv_bn_act(x2, p["id_w"], p["id_b"], p["id_bn_g"], p["id_bn_b"],
                     act="gelu", stride=1, padding=1)
    f3 = conv_bn_act(x3, p["down2_w"], p["down2_b"], p["down2_bn_g"],
                     p["down2_bn_b"], act="gelu", stride=2, padding=1)
    return [f0, f1, f2, f3]


def psp_module(x, p, bins):
    B, H, W, C = x.shape
    HW = H * W
    nb = len(bins)
    cmid = p["psp_stage_w"][0].shape[0]
    x_flat = x.reshape(B, HW, C)
    offs = np.cumsum([0] + [s * s for s in bins])
    Rtot = int(offs[-1])

    # 1) all adaptive pools in ONE resample launch
    P_cat = jnp.asarray(np.concatenate(
        [np.kron(_adaptive_pool_matrix_np(s, H), _adaptive_pool_matrix_np(s, W))
         for s in bins], axis=0))                                  # (Rtot, HW)
    pooled = pallas_resample(x_flat, P_cat)                        # (B, Rtot, C)

    # 2) all 1x1 stage convs in ONE matmul (weights concatenated along N)
    w_cat = jnp.concatenate(
        [jnp.transpose(wi, (2, 3, 1, 0)).reshape(C, cmid) for wi in p["psp_stage_w"]],
        axis=1)                                                    # (C, nb*cmid)
    conv_all = pallas_matmul(pooled.reshape(B * Rtot, C), w_cat)   # (B*Rtot, nb*cmid)
    conv_b = conv_all.reshape(B, Rtot, nb * cmid)

    # 3) per-stage BN stats (tiny, in JAX) folded into ONE masked affine+ReLU
    S = jnp.zeros((Rtot, nb * cmid), jnp.float32)
    T = jnp.zeros((Rtot, nb * cmid), jnp.float32)
    for i in range(nb):
        r0, r1 = int(offs[i]), int(offs[i + 1])
        c0, c1 = i * cmid, (i + 1) * cmid
        blk = conv_b[:, r0:r1, c0:c1]
        mean = jnp.mean(blk, axis=(0, 1))
        var = jnp.maximum(jnp.mean(blk * blk, axis=(0, 1)) - mean * mean, 0.0)
        sc = p["psp_stage_bn_g"][i] / jnp.sqrt(var + 1e-5)
        sh = p["psp_stage_bn_b"][i] - mean * sc
        S = S.at[r0:r1, c0:c1].set(jnp.broadcast_to(sc, (r1 - r0, cmid)))
        T = T.at[r0:r1, c0:c1].set(jnp.broadcast_to(sh, (r1 - r0, cmid)))
    act_all = pallas_affine_act(conv_all, jnp.tile(S, (B, 1)), jnp.tile(T, (B, 1)),
                                act="relu")                        # masked -> 0 elsewhere

    # 4) all bilinear upsamples back to (H, W) in ONE resample; the output
    #    columns are already the channel-concatenated stage results.
    R_cat = np.zeros((HW, Rtot), np.float32)
    for i, s in enumerate(bins):
        R_cat[:, int(offs[i]):int(offs[i + 1])] = np.kron(
            _interp_matrix_np(H, s), _interp_matrix_np(W, s))
    up_all = pallas_resample(act_all.reshape(B, Rtot, nb * cmid),
                             jnp.asarray(R_cat))                   # (B, HW, nb*cmid)

    cat = jnp.concatenate([x_flat, up_all], axis=-1).reshape(B, H, W, C + nb * cmid)
    return conv_bn_act(cat, p["psp_bott_w"], None, p["psp_bott_bn_g"],
                       p["psp_bott_bn_b"], act="relu", stride=1, padding=1)


def fpn_module(features, p):
    feats = list(features)
    B = feats[0].shape[0]
    C = feats[0].shape[-1]

    # 1x1 projections of features[1:], fused into ONE matmul (weights along N).
    sizes = [(f.shape[1], f.shape[2]) for f in feats[1:]]
    xs = [f.reshape(-1, C) for f in feats[1:]]
    row_off = np.cumsum([0] + [x.shape[0] for x in xs])
    w_cat = jnp.concatenate(
        [jnp.transpose(w, (2, 3, 1, 0)).reshape(C, C) for w in p["fpn_proj_w"]], axis=1)
    b_cat = jnp.concatenate(p["fpn_proj_b"])
    proj = pallas_matmul(jnp.concatenate(xs, axis=0), w_cat, b_cat)
    for k in range(1, len(feats)):
        h, w_ = sizes[k - 1]
        r0, r1 = int(row_off[k - 1]), int(row_off[k])
        feats[k] = proj[r0:r1, (k - 1) * C:k * C].reshape(B, h, w_, C)

    # top-down: resize + add fused in the resample kernel (residual input).
    pyr = []
    for i in reversed(range(1, len(feats))):
        tgt = feats[i - 1]
        pyr.append(bilinear_resize_add(feats[i], tgt.shape[1], tgt.shape[2],
                                       residual=tgt))

    pyr = [conv2d(x, p["fpn_smooth_w"][k], p["fpn_smooth_b"][k],
                  stride=1, padding=1) for k, x in enumerate(pyr)]
    pyr = list(reversed(pyr))
    pyr.append(feats[-1])

    H, W = pyr[0].shape[1], pyr[0].shape[2]
    pyr[1:] = [bilinear_resize_add(x, H, W) for x in pyr[1:]]
    cat = jnp.concatenate(pyr, axis=-1)
    return conv_bn_act(cat, p["fpn_fusion_w"], None, p["fpn_fusion_bn_g"],
                       p["fpn_fusion_bn_b"], act="relu", stride=1, padding=1)


def upernet_head(inputs_nchw, p, bins):
    feats = [jnp.transpose(x, (0, 2, 3, 1)).astype(jnp.float32) for x in inputs_nchw]
    pyr = feature2pyramid(feats, p)
    pyr[-1] = psp_module(pyr[-1], p, bins)
    out = fpn_module(pyr, p)
    out = conv2d(out, p["head_w"], p["head_b"], stride=1, padding=1)
    return jnp.transpose(out, (0, 3, 1, 2))  # back to NCHW (B, ncls, 4H, 4W)


# ----------------------------------------------------------------------------
# deterministic synthetic parameters
# ----------------------------------------------------------------------------
def init_params(key, E, channels, ncls, bins):
    keys = iter(jax.random.split(key, 128))

    def w(*shape):
        return 0.05 * jax.random.normal(next(keys), shape, jnp.float32)

    def vec(n):
        return 0.02 * jax.random.normal(next(keys), (n,), jnp.float32)

    p = {}
    # Feature2Pyramid
    p["up4_ct1_w"] = w(E, E, 2, 2); p["up4_ct1_b"] = vec(E)
    p["up4_bn_g"] = 1.0 + vec(E);   p["up4_bn_b"] = vec(E)
    p["up4_ct2_w"] = w(E, E, 2, 2); p["up4_ct2_b"] = vec(E)
    p["up2_ct_w"] = w(E, E, 2, 2);  p["up2_ct_b"] = vec(E)
    p["up2_bn_g"] = 1.0 + vec(E);   p["up2_bn_b"] = vec(E)
    p["id_w"] = w(E, E, 3, 3);      p["id_b"] = vec(E)
    p["id_bn_g"] = 1.0 + vec(E);    p["id_bn_b"] = vec(E)
    p["down2_w"] = w(E, E, 3, 3);   p["down2_b"] = vec(E)
    p["down2_bn_g"] = 1.0 + vec(E); p["down2_bn_b"] = vec(E)
    # PSP
    cin = channels[-1]
    cmid = cin // len(bins)
    p["psp_stage_w"] = [w(cmid, cin, 1, 1) for _ in bins]
    p["psp_stage_bn_g"] = [1.0 + vec(cmid) for _ in bins]
    p["psp_stage_bn_b"] = [vec(cmid) for _ in bins]
    p["psp_bott_w"] = w(cin, cin + len(bins) * cmid, 3, 3)
    p["psp_bott_bn_g"] = 1.0 + vec(cin)
    p["psp_bott_bn_b"] = vec(cin)
    # FPN
    c0 = channels[0]
    p["fpn_proj_w"] = [w(c0, c, 1, 1) for c in channels[1:]]
    p["fpn_proj_b"] = [vec(c0) for _ in channels[1:]]
    p["fpn_smooth_w"] = [w(c0, c0, 3, 3) for _ in range(len(channels) - 1)]
    p["fpn_smooth_b"] = [vec(c0) for _ in range(len(channels) - 1)]
    p["fpn_fusion_w"] = w(c0, len(channels) * c0, 3, 3)
    p["fpn_fusion_bn_g"] = 1.0 + vec(c0)
    p["fpn_fusion_bn_b"] = vec(c0)
    # head
    p["head_w"] = w(ncls, c0, 3, 3)
    p["head_b"] = vec(ncls)
    return p


if __name__ == "__main__":
    B = 2
    E = 32                        # config.encoder_embed_dim
    channels = [32, 32, 32, 32]   # config.channels_per_layer (ViT: same per layer)
    ncls = 5                      # config.num_segmentation_classes
    bins = [1, 2, 4, 6]           # PSPModule bin_sizes
    Hs = Ws = 8                   # ViT feature-map spatial size

    key = jax.random.PRNGKey(0)
    kp, ki = jax.random.split(key)
    params = init_params(kp, E, channels, ncls, bins)
    in_keys = jax.random.split(ki, 4)
    inputs = [jax.random.normal(k, (B, E, Hs, Ws), jnp.float32) for k in in_keys]

    out = upernet_head(inputs, params, bins)
    out = jax.block_until_ready(out)
    assert out.shape == (B, ncls, 4 * Hs, 4 * Ws), out.shape
    assert bool(jnp.all(jnp.isfinite(out)))
    print("KERNEL_OK")
</pallas_src>

<mosaic_0001>
module attributes {stable_mosaic.version = 11 : i64} {
  func.func @_mm_kernel(%arg0: i32, %arg1: memref<64x32xf32, #tpu.memory_space<vmem>>, %arg2: memref<32x128xbf16, #tpu.memory_space<vmem>>, %arg3: memref<1x128xf32, #tpu.memory_space<vmem>>, %arg4: memref<64x128xf32, #tpu.memory_space<vmem>>, %arg5: memref<1x1x128xf32, #tpu.memory_space<vmem>>, %arg6: memref<1x1x128xf32, #tpu.memory_space<vmem>>) attributes {dimension_semantics = [#tpu.dimension_semantics<parallel>], iteration_bounds = array<i64: 2>, scalar_prefetch = 0 : i64, scratch_operands = 0 : i64, tpu.core_type = #tpu.core_type<tc>, window_params = [{transform_indices = @transform_0, window_bounds = array<i64: 64, 32>}, {pipeline_mode = #tpu.pipeline_mode<synchronous>, transform_indices = @transform_1, window_bounds = array<i64: 32, 128>}, {pipeline_mode = #tpu.pipeline_mode<synchronous>, transform_indices = @transform_2, window_bounds = array<i64: 1, 128>}, {transform_indices = @transform_3, window_bounds = array<i64: 64, 128>}, {transform_indices = @transform_4, window_bounds = array<i64: 1, 1, 128>}, {transform_indices = @transform_5, window_bounds = array<i64: 1, 1, 128>}]} {
    %c0 = arith.constant 0 : index
    %c0_0 = arith.constant 0 : index
    %0 = vector.load %arg1[%c0, %c0_0] : memref<64x32xf32, #tpu.memory_space<vmem>>, vector<64x32xf32>
    %1 = arith.truncf %0 : vector<64x32xf32> to vector<64x32xbf16>
    %c0_1 = arith.constant 0 : index
    %c0_2 = arith.constant 0 : index
    %2 = vector.load %arg2[%c0_1, %c0_2] : memref<32x128xbf16, #tpu.memory_space<vmem>>, vector<32x128xbf16>
    %cst = arith.constant dense<0.000000e+00> : vector<64x128xf32>
    %3 = tpu.matmul %1, %2, %cst {dimension_numbers = #tpu.dot_dimension_numbers<[1], [0], [0], [1], [0, 0, 1, 1], [], []>} : vector<64x32xbf16>, vector<32x128xbf16>, vector<64x128xf32> -> vector<64x128xf32>
    %c0_3 = arith.constant 0 : index
    %c0_4 = arith.constant 0 : index
    %4 = vector.load %arg3[%c0_3, %c0_4] : memref<1x128xf32, #tpu.memory_space<vmem>>, vector<1x128xf32>
    %5 = vector.broadcast %4 : vector<1x128xf32> to vector<64x128xf32>
    %6 = arith.addf %3, %5 : vector<64x128xf32>
    %c0_5 = arith.constant 0 : index
    %c0_6 = arith.constant 0 : index
    %7 = vector.load %arg4[%c0_5, %c0_6] : memref<64x128xf32, #tpu.memory_space<vmem>>, vector<64x128xf32>
    tpu.vector_store %arg4[%c0_5, %c0_6], %6 {strides = array<i32>} : memref<64x128xf32, #tpu.memory_space<vmem>>, vector<64x128xf32>,
    %cst_7 = arith.constant dense<0.000000e+00> : vector<128xf32>
    %8 = vector.multi_reduction <add>, %6, %cst_7 [0] : vector<64x128xf32> to vector<128xf32>
    %9 = vector.shape_cast %8 : vector<128xf32> to vector<1x128xf32>
    %10 = vector.shape_cast %9 : vector<1x128xf32> to vector<1x1x128xf32>
    %c0_8 = arith.constant 0 : index
    %c0_9 = arith.constant 0 : index
    %c0_10 = arith.constant 0 : index
    %11 = vector.load %arg5[%c0_8, %c0_9, %c0_10] : memref<1x1x128xf32, #tpu.memory_space<vmem>>, vector<1x1x128xf32>
    tpu.vector_store %arg5[%c0_8, %c0_9, %c0_10], %10 {strides = array<i32>} : memref<1x1x128xf32, #tpu.memory_space<vmem>>, vector<1x1x128xf32>,
    %12 = arith.mulf %6, %6 : vector<64x128xf32>
    %cst_11 = arith.constant dense<0.000000e+00> : vector<128xf32>
    %13 = vector.multi_reduction <add>, %12, %cst_11 [0] : vector<64x128xf32> to vector<128xf32>
    %14 = vector.shape_cast %13 : vector<128xf32> to vector<1x128xf32>
    %15 = vector.shape_cast %14 : vector<1x128xf32> to vector<1x1x128xf32>
    %c0_12 = arith.constant 0 : index
    %c0_13 = arith.constant 0 : index
    %c0_14 = arith.constant 0 : index
    %16 = vector.load %arg6[%c0_12, %c0_13, %c0_14] : memref<1x1x128xf32, #tpu.memory_space<vmem>>, vector<1x1x128xf32>
    tpu.vector_store %arg6[%c0_12, %c0_13, %c0_14], %15 {strides = array<i32>} : memref<1x1x128xf32, #tpu.memory_space<vmem>>, vector<1x1x128xf32>,
    return
  }
  func.func @transform_0(%arg0: i32) -> (i32, i32) {
    %c0_i32 = arith.constant 0 : i32
    %c0_i32_0 = arith.constant 0 : i32
    return %arg0, %c0_i32 : i32, i32
  }
  func.func @transform_1(%arg0: i32) -> (i32, i32) {
    %c0_i32 = arith.constant 0 : i32
    %c0_i32_0 = arith.constant 0 : i32
    %c0_i32_1 = arith.constant 0 : i32
    return %c0_i32, %c0_i32_0 : i32, i32
  }
  func.func @transform_2(%arg0: i32) -> (i32, i32) {
    %c0_i32 = arith.constant 0 : i32
    %c0_i32_0 = arith.constant 0 : i32
    %c0_i32_1 = arith.constant 0 : i32
    return %c0_i32, %c0_i32_0 : i32, i32
  }
  func.func @transform_3(%arg0: i32) -> (i32, i32) {
    %c0_i32 = arith.constant 0 : i32
    %c0_i32_0 = arith.constant 0 : i32
    return %arg0, %c0_i32 : i32, i32
  }
  func.func @transform_4(%arg0: i32) -> (i32, i32, i32) {
    %c0_i32 = arith.constant 0 : i32
    %c0_i32_0 = arith.constant 0 : i32
    %c0_i32_1 = arith.constant 0 : i32
    return %arg0, %c0_i32, %c0_i32_0 : i32, i32, i32
  }
  func.func @transform_5(%arg0: i32) -> (i32, i32, i32) {
    %c0_i32 = arith.constant 0 : i32
    %c0_i32_0 = arith.constant 0 : i32
    %c0_i32_1 = arith.constant 0 : i32
    return %arg0, %c0_i32, %c0_i32_0 : i32, i32, i32
  }
}

</mosaic_0001>

<bundles_post_ra>
// kernel: tpu_custom_call.1
= control target key start
LH: loop header
LB: loop body
LE: loop exit
PB: predicated region body
PF: predicated region fallthrough
CT: control target
= control target key end

     0   :  { %11 = vsyncpa [#allocation3], 0  ;;  %s1002_s0 = inlined_call_operand.vmem [shape: f32[128,32], index: 0, kind: input, shape index: {}]   ;;  %s1003_s1 = inlined_call_operand.vmem [shape: bf16[32,128], index: 1, kind: input, shape index: {}]   ;;  %s1004_s2 = inlined_call_operand.vmem [shape: f32[1,128], index: 2, kind: input, shape index: {}]   ;;  %s1005_s3 = inlined_call_operand.hbm [shape: f32[128,128], index: 3, kind: output, shape index: {0}]   ;;  %s1006_s4 = inlined_call_operand.hbm [shape: f32[2,1,128], index: 4, kind: output, shape index: {1}]   ;;  %s1007_s5 = inlined_call_operand.hbm [shape: f32[2,1,128], index: 5, kind: output, shape index: {2}]  }
   0x1   :  { %13 = vsyncpa [#allocation3 + $0x1], 0 }
   0x2   :  { %14 = vsyncpa [#allocation5], 0 }
   0x3   :  { %16 = vsyncpa [#allocation5 + $0x1], 0  ;;  %s813_s18 = smov 0   ;;  %s815_s19 = smov 0  }
   0x4   :  { %s817_s20 = smov 0   ;;  %s819_s21 = smov 0  }
   0x5 LB: > { %s834_s22 = sadd.s32 4294967295, %s776_s21   ;;  %s563_s23 = sadd.s32 4294967294, %s776_s21   ;;  %s776_s21 = sphi %s819_s21, %s1013_s21   ;;  %s772_s20 = sphi %s817_s20, %s1012_s20   ;;  %s768_s19 = sphi %s815_s19, %s1011_s19   ;;  %s764_s18 = sphi %s813_s18, %s1010_s18  }
   0x6   : > { %s838_s24 = sadd.s32 1, %s776_s21   ;;  %s97_s25 = sadd.s32 1, %s772_s20 }
   0x7   : > { %s94_s26 = ssub.s32 %s776_s21, %s838_s24  ;;  %p107_p0 = scmp.ne.s32.totalorder %s772_s20, %s768_s19 }
   0x8   : > { %p95_p1 = scmp.eq.s32.totalorder %s94_s26, 0  ;;  %p108_p2 = scmp.eq.s32.totalorder %s834_s22, 1 }
   0x9   : > { %p113_p3 = scmp.ne.s32.totalorder %s768_s19, %s764_s18  ;;  %p114_p4 = scmp.eq.s32.totalorder %s563_s23, 1 }
   0xa   : > { %s851_s27 = scalar_select %p95_p1, %s772_s20, %s97_s25  }
   0xb   : > { %p853_p5 = por %p108_p2, %p107_p0  ;;  %p857_p6 = por %p114_p4, %p113_p3 }
   0xc   : > { %p566_p7 = scmp.ge.s32.totalorder %s776_s21, 1  ;;  %p199_p8 = scmp.lt.s32.totalorder %s776_s21, 3 }
   0xe   : > { %p200_p9 = pnand %p566_p7, %p199_p8 }
   0xf   : > { %s568_s7 = sshll.u32 (!%p200_p9), %s834_s22, 3  ;;  %s874_s14 = sand.u32 (!%p200_p9), 1, %s768_s19  }
  0x10   : > { %203 = sbr.rel (%p200_p9) target bundleno = 301 (0x12d), region = 32  ;;  %p236_p10 = scmp.lt.s32.totalorder (!%p200_p9), %s568_s7, 15 }
  0x11   : > { %s567_s15 = sshll.u32 (!%p200_p9), %s874_s14, 6  ;;  %s584_s26 = sshll.u32 (!%p200_p9), %s834_s22, 10 }
  0x12   : > { %s222_s25 = scalar_lea.vmem (!%p200_p9), [#allocation2], %s567_s15  ;;  %s887_s8 = scalar_lea.hbm (!%p200_p9), %s1005_s3, %s584_s26 }
  0x13   : > { %s422_s30 = sshll.u32 (!%p200_p9), %s222_s25, 4  ;;  %s401_s9 = scalar_lea.sflag (!%p200_p9), [#allocation3], %s874_s14  ;;  %s889_s30 = int_to_ptr.vmem [resolvable:$true] %s422_s30 }
  0x14   : > { %s778_s11 = smov (!%p200_p9), [#allocation2]  }
  0x15   : > { %v658_v0 = vld [vmem:[%s1003_s1 + $0x8] sm:$0xff]   ;;  %v659_v1 = vld [vmem:[%s1003_s1] sm:$0xff]   ;;  %s1015_s7 = smov (!%p236_p10, %s568_s7), 15  ;;  %vm278_vm0 = vcmask 261120   ;;  %s664_s12 = sshll.u32 %s778_s11, 4  ;;  %s665_s12 = int_to_ptr.vmem [resolvable:$false] %s664_s12 }
  0x16   : > { %591 = vmatprep.subr.bf16.mxu0 %v658_v0  ;;  %603 = vmatprep.subr.bf16.mxu1 %v658_v0  ;;  %s569_s10 = sshll.u32 %s1015_s7, 3  ;;  %v570_v14 = vld [vmem:[%s1004_s2] ss:$0 sm:$0xff]  ;;  %p667_p0 = scmp.lt.s32.totalorder %s889_s30, %s665_s12 }
  0x17   : > { %592 = vmatpush3.bf16.msra.mxu0 %v658_v0  ;;  %605 = vmatpush3.bf16.msra.mxu1 %v658_v0  ;;  %s239_s13 = scalar_lea.vmem %s1002_s0, %s569_s10  ;;  %s660_s10 = scalar_lea.vmem %s889_s30, 1024 }
  0x18   : > { %593 = vmatprep.subr.bf16.mxu0 %v659_v1  ;;  %604 = vmatprep.subr.bf16.mxu1 %v659_v1  ;;  %v243_v2 = vld [vmem:[%s239_s13] sm:$0xff]  ;;  %v244_v3 = vld [vmem:[%s239_s13 + $0x8] sm:$0xff]  ;;  %v245_v4 = vld [vmem:[%s239_s13 + $0x10] sm:$0xff]  ;;  %p661_p11 = scmp.ne.s32.totalorder %s889_s30, %s660_s10 }
  0x19   : > { %v251_v5 = vpack.c.bf16 %v244_v3, %v243_v2  ;;  %v246_v6 = vld [vmem:[%s239_s13 + $0x18] sm:$0xff]  ;;  %v247_v7 = vld [vmem:[%s239_s13 + $0x20] sm:$0xff]  ;;  %v248_v8 = vld [vmem:[%s239_s13 + $0x28] sm:$0xff] }
  0x1a   : > { %v252_v9 = vpack.c.bf16 %v246_v6, %v245_v4  ;;  %v253_v10 = vpack.c.bf16 %v248_v8, %v247_v7  ;;  %v249_v11 = vld [vmem:[%s239_s13 + $0x30] sm:$0xff]  ;;  %v250_v12 = vld [vmem:[%s239_s13 + $0x38] sm:$0xff]  ;;  %p662_p12 = pnand %p661_p11, %p853_p5  ;;  %s666_s13 = scalar_lea.vmem %s665_s12, 2048 }
  0x1b   : > { %594 = vmatpush3.bf16.msra.mxu0 %v659_v1  ;;  %606 = vmatpush3.bf16.msra.mxu1 %v659_v1  ;;  %v254_v13 = vpack.c.bf16 %v250_v12, %v249_v11  ;;  %p668_p1 = scmp.lt.s32.totalorder %s666_s13, %s660_s10 }
  0x1c   : > { %595 = vmatprep.mubr.msk.bf16.mxu0 %vm278_vm0, %v251_v5  ;;  %599 = vmatprep.mubr.msk.bf16.mxu1 %vm278_vm0, %v253_v10  ;;  %p663_p13 = pneg %p662_p12 }
  0x1d   : > { %p669_p2 = por %p668_p1, %p667_p0 }
  0x1e   : > { %596 = vmatmul.mubr.msk.bf16.vlgmr.msra.gmra.mxu0 %vm278_vm0, %v252_v9  ;;  %600 = vmatmul.mubr.msk.bf16.vlgmr.msra.gmra.mxu1 %vm278_vm0, %v254_v13 }
  0x1f   : > { %p670_p3 = pnand %p669_p2, %p663_p13 }
  0xde   : > { %v597_v15 = vpop.f32.mrf.mxu0  ;;  %v601_v17 = vpop.f32.mrf.mxu1 }
  0xdf   : > { %v334_v16 = vadd.f32 %v597_v15, %v570_v14  ;;  %v880_v19 = vadd.f32 %v601_v17, %v570_v14 }
  0xe0   : > { %v325_v18 = vpop.f32.mrf.mxu0  ;;  %v341_v21 = vpop.f32.mrf.mxu1 }
  0xe1   : > { %358 = vst [vmem:[%s222_s25 + $0x10] sm:$0xff] %v334_v16  ;;  %v326_v20 = vadd.f32 %v570_v14, %v325_v18  ;;  %362 = vst [vmem:[%s222_s25 + $0x30] sm:$0xff] %v880_v19  ;;  %v342_v23 = vadd.f32 %v570_v14, %v341_v21  ;;  %v380_v34 = vmul.f32 %v334_v16, %v334_v16 }
  0xe2   : > { %v598_v22 = vpop.f32.mrf.mxu0  ;;  %v602_v25 = vpop.f32.mrf.mxu1 }
  0xe3   : > { %356 = vst [vmem:[%s222_s25] sm:$0xff] %v326_v20  ;;  %v337_v24 = vadd.f32 %v598_v22, %v570_v14  ;;  %360 = vst [vmem:[%s222_s25 + $0x20] sm:$0xff] %v342_v23  ;;  %v353_v27 = vadd.f32 %v602_v25, %v570_v14  ;;  %v378_v31 = vmul.f32 %v326_v20, %v326_v20 }
  0xe4   : > { %v328_v26 = vpop.f32.mrf.mxu0  ;;  %v344_v29 = vpop.f32.mrf.mxu1 }
  0xe5   : > { %359 = vst [vmem:[%s222_s25 + $0x18] sm:$0xff] %v337_v24  ;;  %v329_v28 = vadd.f32 %v570_v14, %v328_v26  ;;  %363 = vst [vmem:[%s222_s25 + $0x38] sm:$0xff] %v353_v27  ;;  %v345_v30 = vadd.f32 %v570_v14, %v344_v29 }
  0xe7   : > { %357 = vst [vmem:[%s222_s25 + $0x8] sm:$0xff] %v329_v28  ;;  %v364_v32 = vadd.f32 %v329_v28, %v326_v20  ;;  %v379_v33 = vmul.f32 %v329_v28, %v329_v28  ;;  %361 = vst [vmem:[%s222_s25 + $0x28] sm:$0xff] %v345_v30 }
  0xe9   : > { %v365_v35 = vadd.f32 %v364_v32, %v334_v16  ;;  %v386_v36 = vadd.f32 %v379_v33, %v378_v31 }
  0xea   : > { %673 = shalt.err (!%p670_p3)
}
  0xeb   : > { %s674_s15 = scalar_lea.hbm %s887_s8, 1024  ;;  %s678_s25 = scalar_lea.hbm %s1005_s3, 2048 }
  0xec   : > { %p675_p4 = scmp.ne.s32.totalorder %s887_s8, %s674_s15  ;;  %p679_p9 = scmp.lt.s32.totalorder %s887_s8, %s1005_s3 }
  0xed   : > { %p680_p10 = scmp.lt.s32.totalorder %s678_s25, %s674_s15 }
  0xee   : > { %p676_p7 = pnand %p675_p4, %p853_p5 }
  0xef   : > { %p681_p11 = por %p680_p10, %p679_p9 }
  0xf0   : > { %p677_p8 = pneg %p676_p7 }
  0xf2   : > { %p682_p12 = pnand %p681_p11, %p677_p8 }
  0xf4   : > { %685 = shalt.err (!%p682_p12)
}
  0xf5   : > { %s779_s7 = smov 128   ;;  %s780_s10 = smov 8   ;;  %v381_v37 = vmul.f32 %v337_v24, %v337_v24  ;;  %v387_v38 = vadd.f32 %v386_v36, %v380_v34  ;;  %v366_v39 = vadd.f32 %v365_v35, %v337_v24  ;;  %v382_v40 = vmul.f32 %v342_v23, %v342_v23 }
  0xf6   : > { %607 = dma.vmem_to_hbm [thread:$0]  (%p853_p5), %s889_s30, 1024, %s887_s8, %s401_s9, %s779_s7, %s779_s7, %s780_s10   ;;  %v383_v44 = vmul.f32 %v345_v30, %v345_v30  ;;  %v384_v46 = vmul.f32 %v880_v19, %v880_v19  ;;  %v385_v49 = vmul.f32 %v353_v27, %v353_v27 }
  0xf7   : > { %v367_v41 = vadd.f32 %v366_v39, %v342_v23  ;;  %v388_v42 = vadd.f32 %v387_v38, %v381_v37  ;;  %s405_s30 = sand.u32 1, %s834_s22   ;;  %s580_s8 = sshll.u32 %s834_s22, 4 }
  0xf8   : > { %s228_s9 = scalar_lea.vmem [#allocation4], %s874_s14  ;;  %s234_s12 = scalar_lea.vmem [#allocation6], %s874_s14 }
  0xf9   : > { %v368_v43 = vadd.f32 %v367_v41, %v345_v30  ;;  %v389_v45 = vadd.f32 %v388_v42, %v382_v40  ;;  %s438_s11 = sshll.u32 %s228_s9, 4  ;;  %s451_s13 = sshll.u32 %s234_s12, 4  ;;  %s928_s11 = int_to_ptr.vmem [resolvable:$true] %s438_s11  ;;  %s935_s13 = int_to_ptr.vmem [resolvable:$true] %s451_s13 }
  0xfa   : > { %s926_s17 = scalar_lea.hbm %s1006_s4, %s580_s8  ;;  %s933_s26 = scalar_lea.hbm %s1007_s5, %s580_s8 }
  0xfb   : > { %v369_v47 = vadd.f32 %v368_v43, %v880_v19  ;;  %v390_v48 = vadd.f32 %v389_v45, %v383_v44  ;;  %s937_s6 = scalar_lea.sflag [#allocation5], %s405_s30  ;;  %s686_s7 = scalar_lea.vmem %s928_s11, 16 }
  0xfc   : > { %p687_p13 = scmp.ne.s32.totalorder %s928_s11, %s686_s7  ;;  %s781_s10 = smov [#allocation4]  }
  0xfd   : > { %v370_v50 = vadd.f32 %v369_v47, %v353_v27  ;;  %v391_v51 = vadd.f32 %v390_v48, %v384_v46  ;;  %s690_s15 = sshll.u32 %s781_s10, 4  ;;  %s691_s15 = int_to_ptr.vmem [resolvable:$false] %s690_s15 }
  0xfe   : > { %p688_p0 = pnand %p687_p13, %p853_p5  ;;  %s692_s16 = scalar_lea.vmem %s691_s15, 32 }
  0xff   : > { %v371_v52 = vrot.slane %v370_v50, 4  ;;  %v392_v53 = vadd.f32 %v391_v51, %v385_v49  ;;  %p693_p2 = scmp.lt.s32.totalorder %s928_s11, %s691_s15  ;;  %p694_p3 = scmp.lt.s32.totalorder %s692_s16, %s686_s7 }
 0x100   : > { %p689_p1 = pneg %p688_p0 }
 0x101   : > { %v393_v54 = vrot.slane %v392_v53, 4  ;;  %v372_v55 = vadd.f32 %v371_v52, %v370_v50  ;;  %p695_p4 = por %p694_p3, %p693_p2 }
 0x103   : > { %v373_v56 = vrot.slane %v372_v55, 2  ;;  %v394_v57 = vadd.f32 %v393_v54, %v392_v53  ;;  %p696_p7 = pnand %p695_p4, %p689_p1 }
 0x105   : > { %v374_v58 = vadd.f32 %v373_v56, %v372_v55  ;;  %v395_v59 = vrot.slane %v394_v57, 2 }
 0x107   : > { %v375_v60 = vrot.slane %v374_v58, 1  ;;  %v396_v61 = vadd.f32 %v395_v59, %v394_v57 }
 0x109   : > { %v376_v62 = vadd.f32 %v375_v60, %v374_v58  ;;  %v397_v63 = vrot.slane %v396_v61, 1 }
 0x10b   : > { %377 = vst [vmem:[%s228_s9] sm:$0x1] %v376_v62  ;;  %v398_v0 = vadd.f32 %v397_v63, %v396_v61 }
 0x10c   : > { %699 = shalt.err (!%p696_p7)
}
 0x10d   : > { %s700_s30 = scalar_lea.hbm %s926_s17, 16  ;;  %s704_s22 = scalar_lea.hbm %s1006_s4, 32 }
 0x10e   : > { %p701_p8 = scmp.ne.s32.totalorder %s926_s17, %s700_s30  ;;  %p705_p11 = scmp.lt.s32.totalorder %s926_s17, %s1006_s4 }
 0x10f   : > { %p706_p12 = scmp.lt.s32.totalorder %s704_s22, %s700_s30 }
 0x110   : > { %p702_p9 = pnand %p701_p8, %p853_p5 }
 0x111   : > { %p707_p13 = por %p706_p12, %p705_p11 }
 0x112   : > { %p703_p10 = pneg %p702_p9 }
 0x114   : > { %p708_p0 = pnand %p707_p13, %p703_p10 }
 0x116   : > { %711 = shalt.err (!%p708_p0)
}
 0x117   : > { %608 = dma.vmem_to_hbm [thread:$0]  (%p853_p5), %s928_s11, 16, %s926_s17, %s937_s6   ;;  %399 = vst [vmem:[%s234_s12] sm:$0x1] %v398_v0 }
 0x118   : > { %s712_s7 = scalar_lea.vmem %s935_s13, 16  ;;  %s782_s15 = smov [#allocation6]  }
 0x119   : > { %p713_p1 = scmp.ne.s32.totalorder %s935_s13, %s712_s7  ;;  %s716_s16 = sshll.u32 %s782_s15, 4  ;;  %s717_s16 = int_to_ptr.vmem [resolvable:$false] %s716_s16 }
 0x11a   : > { %s718_s30 = scalar_lea.vmem %s717_s16, 32  ;;  %p719_p4 = scmp.lt.s32.totalorder %s935_s13, %s717_s16 }
 0x11b   : > { %p714_p2 = pnand %p713_p1, %p853_p5  ;;  %p720_p7 = scmp.lt.s32.totalorder %s718_s30, %s712_s7 }
 0x11d   : > { %p715_p3 = pneg %p714_p2  ;;  %p721_p8 = por %p720_p7, %p719_p4 }
 0x11f   : > { %p722_p9 = pnand %p721_p8, %p715_p3 }
 0x121   : > { %725 = shalt.err (!%p722_p9)
}
 0x122   : > { %s726_s14 = scalar_lea.hbm %s933_s26, 16  ;;  %s730_s17 = scalar_lea.hbm %s1007_s5, 32 }
 0x123   : > { %p727_p10 = scmp.ne.s32.totalorder %s933_s26, %s726_s14  ;;  %p731_p13 = scmp.lt.s32.totalorder %s933_s26, %s1007_s5 }
 0x124   : > { %p732_p0 = scmp.lt.s32.totalorder %s730_s17, %s726_s14 }
 0x125   : > { %p728_p11 = pnand %p727_p10, %p853_p5 }
 0x126   : > { %p733_p1 = por %p732_p0, %p731_p13 }
 0x127   : > { %p729_p12 = pneg %p728_p11 }
 0x129   : > { %p734_p2 = pnand %p733_p1, %p729_p12 }
 0x12b   : > { %737 = shalt.err (!%p734_p2)
}
 0x12c   : > { %609 = dma.vmem_to_hbm [thread:$0]  (%p853_p5), %s935_s13, 16, %s933_s26, %s937_s6  }
 0x12d PF: > { %p623_p3 = scmp.ge.s32.totalorder %s776_s21, 2  ;;  %s463_s22 = sand.u32 1, %s764_s18  }
 0x12e   : > { %s464_s25 = scalar_lea.sflag [#allocation3], %s463_s22 }
 0x12f   : > { %p614_p4 = pnand %p623_p3, %p857_p6 }
 0x131   : > { %p615_p7 = pneg %p614_p4 }
 0x133   : > { %755 = dma.done.wait (%p615_p7), %s464_s25, 1024  }
 0x134   : > { %757 = vsyncadd (%p615_p7), %s464_s25, 4294966272  ;;  %s472_s10 = sand.u32 1, %s563_s23  }
 0x135   : > { %s473_s28 = scalar_lea.sflag [#allocation5], %s472_s10 }
 0x136   : > { %759 = dma.done.wait (%p615_p7), %s473_s28, 32  }
 0x137   : > { %761 = vsyncadd (%p615_p7), %s473_s28, 4294967264  ;;  %p19_p5 = scmp.ge.s32.totalorder %s838_s24, 4   ;;  %s1010_s18 = smov %s768_s19 }
 0x138   : > { %s1011_s19 = smov %s772_s20  ;;  %s1012_s20 = smov %s851_s27 }
 0x139   : > { %s1013_s21 = smov %s838_s24  ;;  %21 = sbr.rel (!%p19_p5) target bundleno = 5 (0x5), region = 99 }
 0x13e   :  { %485 = vsyncpa [#allocation3], 1 }
 0x13f   :  { %487 = vsyncpa [#allocation3 + $0x1], 1 }
 0x140   :  { %488 = vsyncpa [#allocation5], 1 }
 0x141   :  { %490 = vsyncpa [#allocation5 + $0x1], 1 }

</bundles_post_ra>
